<compile_context>
chip_gen: v7x
topology: tpu7x:2x2x1
jax: 0.10.0
libtpu: 0.0.40
codegen_flags: <defaults>
</compile_context>

<pallas_src>
import functools

import jax
import jax.numpy as jnp
from jax import lax
from jax.experimental import pallas as pl
from jax.experimental.pallas import tpu as pltpu


def _round_up(x, m):
    return ((x + m - 1) // m) * m


def _pad_to(a, shape):
    pads = [(0, s - d) for d, s in zip(a.shape, shape)]
    if any(p[1] for p in pads):
        a = jnp.pad(a, pads)
    return a


# ----------------------------------------------------------------------------
# Pooling branch: MaxPool2d(kernel=2, stride=2)
# ----------------------------------------------------------------------------
def _maxpool_kernel(x_ref, o_ref, *, wo):
    # x_ref: (TR, 2*wo) -- row p holds [top image row | bottom image row] of
    #                      the p-th 2-row window (already horizontally reduced).
    # o_ref: (TR, wo)
    xb = x_ref[...]
    o_ref[...] = jnp.maximum(xb[:, :wo], xb[:, wo:])


def maxpool2x2(x):
    """x: (N, C, H, W) -> (N, C, H//2, W//2)  (floor, like nn.MaxPool2d(2))."""
    N, C, H, W = x.shape
    Ho, Wo = H // 2, W // 2
    xc = x[:, :, : 2 * Ho, : 2 * Wo]                      # floor crop (PyTorch)

    # Horizontal pair-max: one fused XLA pass (read X, write X/2). No transpose.
    xh = jnp.maximum(xc[..., 0::2], xc[..., 1::2])        # (N, C, 2*Ho, Wo)

    # Vertical pairs are contiguous -> free reshape puts them side by side in
    # the lane dimension; the Pallas kernel reduces them, tiled over rows.
    M = N * C * Ho
    xr = xh.reshape(M, 2 * Wo)

    row_bytes = 2 * Wo * jnp.dtype(x.dtype).itemsize
    tr_cap = max(8, min(2048, (2 * 1024 * 1024) // max(1, row_bytes)))
    tr_cap = max(8, (tr_cap // 8) * 8)
    TR = M if M <= tr_cap else tr_cap                     # block rows

    out = pl.pallas_call(
        functools.partial(_maxpool_kernel, wo=Wo),
        out_shape=jax.ShapeDtypeStruct((M, Wo), x.dtype),
        grid=(pl.cdiv(M, TR),),
        in_specs=[pl.BlockSpec((TR, 2 * Wo), lambda i: (i, 0))],
        out_specs=pl.BlockSpec((TR, Wo), lambda i: (i, 0)),
        compiler_params=pltpu.CompilerParams(
            dimension_semantics=("parallel",)),
    )(xr)
    return out.reshape(N, C, Ho, Wo)


# ----------------------------------------------------------------------------
# Conv branch: Conv2d(Cin, Cout, kernel_size=2, stride=2)
# ----------------------------------------------------------------------------
def _conv_mm_kernel(w_ref, c_ref, b_ref, o_ref, acc_ref):
    # w_ref:  (Cp, tk)   conv weight slab (reduction slice k)
    # c_ref:  (tk, tm)   im2col columns  (reduction slice k, M-tile i)
    # b_ref:  (Cp, 1)    bias
    # o_ref:  (Cp, tm)   output tile (lane dim = M -> unmasked stores)
    # acc_ref:(Cp, tm)   f32 accumulator scratch
    k = pl.program_id(1)

    @pl.when(k == 0)
    def _():
        acc_ref[...] = jnp.zeros_like(acc_ref)

    acc_ref[...] += jnp.dot(w_ref[...], c_ref[...],
                            preferred_element_type=jnp.float32)

    @pl.when(k == pl.num_programs(1) - 1)
    def _():
        o_ref[...] = (acc_ref[...] + b_ref[...]).astype(o_ref.dtype)


def conv2x2_stride2(x, weight, bias):
    """x: (N, Cin, H, W), weight: (Cout, Cin, 2, 2), bias: (Cout,) -> NCHW."""
    N, Cin, H, W = x.shape
    Cout = weight.shape[0]
    Ho, Wo = H // 2, W // 2
    M = N * Ho * Wo
    K = Cin * 4

    # Tile sizes (f32; keep per-step VMEM well under the v7x 64 MiB budget).
    Cp = _round_up(Cout, 8)                       # sublane-aligned output rows
    tk = K if K <= 512 else 512                   # K-reduction tile
    Kp = _round_up(K, tk)
    tm = 512 if Cp <= 256 else 256                # lane tile over M (MXU-sized)
    tm = min(tm, _round_up(M, 128))
    Mp = _round_up(M, tm)

    # im2col in (c, kh, kw) order matching the OIHW weight flattening, laid out
    # transposed so M lands in the lane dimension of the kernel tiles.
    xc = x[:, :, : 2 * Ho, : 2 * Wo]
    cols = xc.reshape(N, Cin, Ho, 2, Wo, 2).transpose(1, 3, 5, 0, 2, 4)
    cols = _pad_to(cols.reshape(K, M), (Kp, Mp))            # (Kp, Mp)
    w2 = _pad_to(weight.reshape(Cout, K), (Cp, Kp))         # (Cp, Kp)
    b2 = _pad_to(bias.reshape(Cout, 1), (Cp, 1))            # (Cp, 1)
    # NOTE: bf16 inputs (with f32 accumulation) would halve HBM/VMEM traffic on
    # the MXU path; kept f32 here to preserve the module's numerics exactly.

    nm, nk = Mp // tm, Kp // tk
    out = pl.pallas_call(
        _conv_mm_kernel,
        out_shape=jax.ShapeDtypeStruct((Cp, Mp), x.dtype),
        grid=(nm, nk),
        in_specs=[
            pl.BlockSpec((Cp, tk), lambda i, k: (0, k)),
            pl.BlockSpec((tk, tm), lambda i, k: (k, i)),
            pl.BlockSpec((Cp, 1), lambda i, k: (0, 0)),
        ],
        out_specs=pl.BlockSpec((Cp, tm), lambda i, k: (0, i)),
        scratch_shapes=[pltpu.VMEM((Cp, tm), jnp.float32)],
        compiler_params=pltpu.CompilerParams(
            dimension_semantics=("parallel", "arbitrary"),
            vmem_limit_bytes=32 * 1024 * 1024),
    )(w2, cols, b2)

    # (Cp, Mp) -> (Cout, N, Ho, Wo) -> NCHW
    y = out[:Cout, :M].reshape(Cout, N, Ho, Wo)
    return y.transpose(1, 0, 2, 3)


# ----------------------------------------------------------------------------
# DownBlock wrapper (mirrors the PyTorch module)
# ----------------------------------------------------------------------------
class DownBlock:
    def __init__(self, method="pooling", in_channel=None, out_channel=None,
                 key=None):
        assert method in ["pooling", "conv"]
        self.method = method
        if method == "conv":
            assert in_channel is not None and out_channel is not None, \
                "channel can't be None."
            key = jax.random.PRNGKey(42) if key is None else key
            kw, kb = jax.random.split(key)
            fan_in = in_channel * 2 * 2
            bound = 1.0 / (fan_in ** 0.5)        # matches nn.Conv2d init range
            self.weight = jax.random.uniform(
                kw, (out_channel, in_channel, 2, 2), jnp.float32,
                minval=-bound, maxval=bound)
            self.bias = jax.random.uniform(
                kb, (out_channel,), jnp.float32, minval=-bound, maxval=bound)

    def __call__(self, x):
        if self.method == "pooling":
            return maxpool2x2(x)
        return conv2x2_stride2(x, self.weight, self.bias)


# ----------------------------------------------------------------------------
# Plain-JAX references for verification
# ----------------------------------------------------------------------------
def _ref_maxpool(x):
    return lax.reduce_window(x, -jnp.inf, lax.max,
                             (1, 1, 2, 2), (1, 1, 2, 2), "VALID")


def _ref_conv(x, w, b):
    y = lax.conv_general_dilated(
        x, w, window_strides=(2, 2), padding="VALID",
        dimension_numbers=("NCHW", "OIHW", "NCHW"))
    return y + b.reshape(1, -1, 1, 1)


if __name__ == "__main__":
    key = jax.random.PRNGKey(0)
    N, C, H, W = 2, 4, 16, 16
    x = jax.random.normal(key, (N, C, H, W), jnp.float32)

    # --- pooling mode (the module's default) ---
    block_pool = DownBlock(method="pooling")
    y_pool = jax.block_until_ready(block_pool(x))
    assert y_pool.shape == (N, C, H // 2, W // 2)
    assert jnp.allclose(y_pool, _ref_maxpool(x), atol=1e-6), "maxpool mismatch"

    # --- conv mode ---
    Cout = 8
    block_conv = DownBlock(method="conv", in_channel=C, out_channel=Cout)
    y_conv = jax.block_until_ready(block_conv(x))
    assert y_conv.shape == (N, Cout, H // 2, W // 2)
    assert jnp.allclose(
        y_conv, _ref_conv(x, block_conv.weight, block_conv.bias),
        atol=1e-4), "conv mismatch"

    print("KERNEL_OK")
</pallas_src>

<mosaic_0001>
module attributes {stable_mosaic.version = 11 : i64} {
  func.func @_maxpool_kernel(%arg0: i32, %arg1: memref<64x16xf32, #tpu.memory_space<vmem>>, %arg2: memref<64x8xf32, #tpu.memory_space<vmem>>) attributes {dimension_semantics = [#tpu.dimension_semantics<parallel>], iteration_bounds = array<i64: 1>, scalar_prefetch = 0 : i64, scratch_operands = 0 : i64, tpu.core_type = #tpu.core_type<tc>, window_params = [{transform_indices = @transform_0, window_bounds = array<i64: 64, 16>}, {transform_indices = @transform_1, window_bounds = array<i64: 64, 8>}]} {
    %c0 = arith.constant 0 : index
    %c0_0 = arith.constant 0 : index
    %0 = vector.load %arg1[%c0, %c0_0] : memref<64x16xf32, #tpu.memory_space<vmem>>, vector<64x16xf32>
    %1 = vector.extract_strided_slice %0 {offsets = [0, 0], sizes = [64, 8], strides = [1, 1]} : vector<64x16xf32> to vector<64x8xf32>
    %2 = vector.extract_strided_slice %0 {offsets = [0, 8], sizes = [64, 8], strides = [1, 1]} : vector<64x16xf32> to vector<64x8xf32>
    %3 = arith.maximumf %1, %2 : vector<64x8xf32>
    %c0_1 = arith.constant 0 : index
    %c0_2 = arith.constant 0 : index
    %4 = vector.load %arg2[%c0_1, %c0_2] : memref<64x8xf32, #tpu.memory_space<vmem>>, vector<64x8xf32>
    tpu.vector_store %arg2[%c0_1, %c0_2], %3 {strides = array<i32>} : memref<64x8xf32, #tpu.memory_space<vmem>>, vector<64x8xf32>,
    return
  }
  func.func @transform_0(%arg0: i32) -> (i32, i32) {
    %c0_i32 = arith.constant 0 : i32
    %c0_i32_0 = arith.constant 0 : i32
    return %arg0, %c0_i32 : i32, i32
  }
  func.func @transform_1(%arg0: i32) -> (i32, i32) {
    %c0_i32 = arith.constant 0 : i32
    %c0_i32_0 = arith.constant 0 : i32
    return %arg0, %c0_i32 : i32, i32
  }
}

</mosaic_0001>

<bundles_post_ra>
// kernel: tpu_custom_call.1
= control target key start
LH: loop header
LB: loop body
LE: loop exit
PB: predicated region body
PF: predicated region fallthrough
CT: control target
= control target key end

     0   :  { %s70_s10 = smov 120   ;;  %vm56_vm0 = vcmask 64512   ;;  %s137_s0 = inlined_call_operand.vmem [shape: f32[64,16], index: 0, kind: input, shape index: {}]   ;;  %s138_s1 = inlined_call_operand.vmem [shape: f32[64,8], index: 1, kind: output, shape index: {}]  }
   0x1   :  { %v10_v0 = vld [vmem:[%s137_s0 + $0x10] sm:$0xff]  ;;  %v8_v1 = vld [vmem:[%s137_s0] sm:$0xff]  ;;  %v11_v2 = vld [vmem:[%s137_s0 + $0x18] sm:$0xff] }
   0x2   :  { %28 = vrot.lane.b32.xlu1 %v10_v0, %s70_s10  ;;  %24 = vrot.lane.b32.xlu0 %v8_v1, %s70_s10  ;;  %v9_v3 = vld [vmem:[%s137_s0 + $0x8] sm:$0xff]  ;;  %v12_v5 = vld [vmem:[%s137_s0 + $0x20] sm:$0xff] }
   0x3   :  { %v13_v4 = vld [vmem:[%s137_s0 + $0x28] sm:$0xff]  ;;  %v15_v6 = vld [vmem:[%s137_s0 + $0x38] sm:$0xff]  ;;  %v14_v7 = vld [vmem:[%s137_s0 + $0x30] sm:$0xff] }
   0x6   :  { %30 = vrot.lane.b32.xlu1 %v11_v2, %s70_s10  ;;  %26 = vrot.lane.b32.xlu0 %v9_v3, %s70_s10 }
   0xa   :  { %34 = vrot.lane.b32.xlu1 %v13_v4, %s70_s10  ;;  %32 = vrot.lane.b32.xlu0 %v12_v5, %s70_s10 }
   0xe   :  { %38 = vrot.lane.b32.xlu1 %v15_v6, %s70_s10  ;;  %36 = vrot.lane.b32.xlu0 %v14_v7, %s70_s10 }
  0x74   :  { %v29_v8 = vpop.permute.xlu1 %28  ;;  %v25_v9 = vpop.permute.xlu0 %24 }
  0x75   :  { %v50_v10 = vmax.f32 %v10_v0, %v29_v8  ;;  %v48_v11 = vmax.f32 %v8_v1, %v25_v9 }
  0x77   :  { %59 = vst.msk [vmem:[%s138_s1 + $0x10] sm:$0xff] %vm56_vm0, %v50_v10  ;;  %57 = vst.msk [vmem:[%s138_s1] sm:$0xff] %vm56_vm0, %v48_v11 }
  0x78   :  { %v31_v12 = vpop.permute.xlu1 %30  ;;  %v27_v13 = vpop.permute.xlu0 %26 }
  0x79   :  { %v51_v14 = vmax.f32 %v11_v2, %v31_v12  ;;  %v49_v15 = vmax.f32 %v9_v3, %v27_v13 }
  0x7b   :  { %60 = vst.msk [vmem:[%s138_s1 + $0x18] sm:$0xff] %vm56_vm0, %v51_v14  ;;  %58 = vst.msk [vmem:[%s138_s1 + $0x8] sm:$0xff] %vm56_vm0, %v49_v15 }
  0x7c   :  { %v35_v16 = vpop.permute.xlu1 %34  ;;  %v33_v17 = vpop.permute.xlu0 %32 }
  0x7d   :  { %v53_v18 = vmax.f32 %v13_v4, %v35_v16  ;;  %v52_v19 = vmax.f32 %v12_v5, %v33_v17 }
  0x7f   :  { %62 = vst.msk [vmem:[%s138_s1 + $0x28] sm:$0xff] %vm56_vm0, %v53_v18  ;;  %61 = vst.msk [vmem:[%s138_s1 + $0x20] sm:$0xff] %vm56_vm0, %v52_v19 }
  0x80   :  { %v39_v20 = vpop.permute.xlu1 %38  ;;  %v37_v21 = vpop.permute.xlu0 %36 }
  0x81   :  { %v55_v22 = vmax.f32 %v15_v6, %v39_v20  ;;  %v54_v23 = vmax.f32 %v14_v7, %v37_v21 }
  0x83   :  { %64 = vst.msk [vmem:[%s138_s1 + $0x38] sm:$0xff] %vm56_vm0, %v55_v22  ;;  %63 = vst.msk [vmem:[%s138_s1 + $0x30] sm:$0xff] %vm56_vm0, %v54_v23 }

</bundles_post_ra>
